<compile_context>
chip_gen: v7x
topology: tpu7x:2x2x1
jax: 0.10.0
libtpu: 0.0.40
codegen_flags: <defaults>
</compile_context>

<pallas_src>
import functools

import jax
import jax.numpy as jnp
from jax.experimental import pallas as pl
from jax.experimental.pallas import tpu as pltpu


def _round_up(x, m):
    return ((x + m - 1) // m) * m


def _dqn_kernel(x_ref, w1_ref, b1_ref, w2_ref, b2_ref, w3_ref, b3_ref, out_ref):
    """Fused forward on one batch tile: relu(x@W1+b1) -> relu(.@W2+b2) -> .@W3+b3."""
    # In-kernel bf16 cast of the activations (rides VPU slack under DMA/MXU).
    x = x_ref[...].astype(jnp.bfloat16)                              # (tb, S)
    h1 = jnp.dot(x, w1_ref[...], preferred_element_type=jnp.float32) + b1_ref[...]
    h1 = jnp.maximum(h1, 0.0).astype(jnp.bfloat16)                   # (tb, Hp) lane-dense
    h2 = jnp.dot(h1, w2_ref[...], preferred_element_type=jnp.float32) + b2_ref[...]
    h2 = jnp.maximum(h2, 0.0)                                        # keep f32 into fc3
    # fc3 entirely in f32 (narrow N=action_size output, stored directly).
    out_ref[...] = (
        jnp.dot(h2, w3_ref[...], preferred_element_type=jnp.float32) + b3_ref[...]
    )


def _pick_batch_tile(B, tile_b):
    """Batch tile: as large as tile_b, multiple of 8, but >=4 grid steps when
    the batch is big enough (v7x megacore sharding + pipeline overlap)."""
    tile_b = max(8, _round_up(tile_b, 8))
    if B < 32:
        return B                                  # one exact (possibly ragged) tile
    return min(tile_b, max(8, _round_up(pl.cdiv(B, 4), 8)))


@functools.partial(jax.jit, static_argnames=("tile_b",))
def dqn_forward(state, w1, b1, w2, b2, w3, b3, *, tile_b=2048):
    """state: (B, state_size) f32. Padded params from pad_params().
    Returns (B, action_size) f32."""
    B, S = state.shape
    Hp = w1.shape[1]          # padded hidden width (multiple of 128)
    A = w3.shape[1]           # action_size (unpadded, narrow output)

    tb = _pick_batch_tile(B, tile_b)
    grid = (pl.cdiv(B, tb),)

    flops = 2 * B * (S * Hp + Hp * Hp + Hp * A)
    bytes_accessed = (
        B * S * 4                                   # state read (f32)
        + (w1.size + w2.size) * 2 + w3.size * 4     # resident weights, read once
        + (b1.size + b2.size + b3.size) * 4
        + B * A * 4                                 # narrow f32 output write
    )

    return pl.pallas_call(
        _dqn_kernel,
        out_shape=jax.ShapeDtypeStruct((B, A), jnp.float32),
        grid=grid,
        in_specs=[
            pl.BlockSpec((tb, S), lambda i: (i, 0)),     # x: tiled over batch
            pl.BlockSpec((S, Hp), lambda i: (0, 0)),     # w1: VMEM-resident (bf16)
            pl.BlockSpec((1, Hp), lambda i: (0, 0)),     # b1 (f32)
            pl.BlockSpec((Hp, Hp), lambda i: (0, 0)),    # w2 (bf16)
            pl.BlockSpec((1, Hp), lambda i: (0, 0)),     # b2 (f32)
            pl.BlockSpec((Hp, A), lambda i: (0, 0)),     # w3 (f32, narrow N)
            pl.BlockSpec((1, A), lambda i: (0, 0)),      # b3 (f32)
        ],
        out_specs=pl.BlockSpec((tb, A), lambda i: (i, 0)),
        compiler_params=pltpu.CompilerParams(
            dimension_semantics=("parallel",),
        ),
        cost_estimate=pl.CostEstimate(
            flops=flops, transcendentals=0, bytes_accessed=bytes_accessed
        ),
    )(state, w1, b1, w2, b2, w3, b3)


def init_params(key, state_size, action_size, fc1_units=64, fc2_units=64):
    """Deterministic init mirroring nn.Linear's U(-1/sqrt(fan_in), 1/sqrt(fan_in))."""
    ks = jax.random.split(key, 6)

    def linear(kw, kb, fan_in, fan_out):
        bound = 1.0 / jnp.sqrt(jnp.float32(fan_in))
        w = jax.random.uniform(kw, (fan_in, fan_out), jnp.float32, -bound, bound)
        b = jax.random.uniform(kb, (1, fan_out), jnp.float32, -bound, bound)
        return w, b

    w1, b1 = linear(ks[0], ks[1], state_size, fc1_units)
    w2, b2 = linear(ks[2], ks[3], fc1_units, fc2_units)
    w3, b3 = linear(ks[4], ks[5], fc2_units, action_size)
    return w1, b1, w2, b2, w3, b3


def pad_params(params):
    """Zero-pad the HIDDEN widths to multiples of 128 (lane-dense h1/h2) and
    cast the fc1/fc2 weights to bf16.  The output width is NOT padded (narrow
    store, no write amplification) and fc3 stays in f32.  Zero padding does not
    change the forward math: padded hidden columns compute relu(0)=0 and padded
    w2/w3 rows contribute 0."""
    w1, b1, w2, b2, w3, b3 = params
    S, H1 = w1.shape
    H2, A = w3.shape
    Hp = _round_up(max(H1, H2, 128), 128)

    def pad2(a, rows, cols):
        return jnp.pad(a, ((0, rows - a.shape[0]), (0, cols - a.shape[1])))

    w1p = pad2(w1, S, Hp).astype(jnp.bfloat16)
    b1p = pad2(b1, 1, Hp)
    w2p = pad2(w2, Hp, Hp).astype(jnp.bfloat16)
    b2p = pad2(b2, 1, Hp)
    w3p = pad2(w3, Hp, A)          # f32, rows padded only
    b3p = b3                       # f32, (1, A)
    return w1p, b1p, w2p, b2p, w3p, b3p


if __name__ == "__main__":
    key = jax.random.PRNGKey(0)
    k_params, k_state = jax.random.split(key)

    batch, state_size, action_size = 2, 8, 4
    params = init_params(k_params, state_size, action_size, fc1_units=64, fc2_units=64)
    padded = pad_params(params)
    state = jax.random.normal(k_state, (batch, state_size), jnp.float32)

    # NOTE: at batch=2 this call is pure launch overhead; in training, batch
    # many environments/timesteps into one dqn_forward call to amortize it.
    out = dqn_forward(state, *padded)
    jax.block_until_ready(out)

    # Pure-JAX f32 reference with the original (unpadded) weights.
    w1, b1, w2, b2, w3, b3 = params
    ref = jnp.maximum(state @ w1 + b1, 0.0)
    ref = jnp.maximum(ref @ w2 + b2, 0.0)
    ref = ref @ w3 + b3

    assert out.shape == (batch, action_size)
    # fc1/fc2 use bf16 MXU operands (f32 accumulation), fc3 is full f32.
    assert jnp.allclose(out, ref, atol=5e-2, rtol=5e-2), (out, ref)

    print("KERNEL_OK")
</pallas_src>

<mosaic_0001>
module attributes {stable_mosaic.version = 11 : i64} {
  func.func @_dqn_kernel(%arg0: i32, %arg1: memref<2x8xf32, #tpu.memory_space<vmem>>, %arg2: memref<8x128xbf16, #tpu.memory_space<vmem>>, %arg3: memref<1x128xf32, #tpu.memory_space<vmem>>, %arg4: memref<128x128xbf16, #tpu.memory_space<vmem>>, %arg5: memref<1x128xf32, #tpu.memory_space<vmem>>, %arg6: memref<128x4xf32, #tpu.memory_space<vmem>>, %arg7: memref<1x4xf32, #tpu.memory_space<vmem>>, %arg8: memref<2x4xf32, #tpu.memory_space<vmem>>) attributes {dimension_semantics = [#tpu.dimension_semantics<parallel>], iteration_bounds = array<i64: 1>, scalar_prefetch = 0 : i64, scratch_operands = 0 : i64, tpu.core_type = #tpu.core_type<tc>, window_params = [{transform_indices = @transform_0, window_bounds = array<i64: 2, 8>}, {pipeline_mode = #tpu.pipeline_mode<synchronous>, transform_indices = @transform_1, window_bounds = array<i64: 8, 128>}, {pipeline_mode = #tpu.pipeline_mode<synchronous>, transform_indices = @transform_2, window_bounds = array<i64: 1, 128>}, {pipeline_mode = #tpu.pipeline_mode<synchronous>, transform_indices = @transform_3, window_bounds = array<i64: 128, 128>}, {pipeline_mode = #tpu.pipeline_mode<synchronous>, transform_indices = @transform_4, window_bounds = array<i64: 1, 128>}, {pipeline_mode = #tpu.pipeline_mode<synchronous>, transform_indices = @transform_5, window_bounds = array<i64: 128, 4>}, {pipeline_mode = #tpu.pipeline_mode<synchronous>, transform_indices = @transform_6, window_bounds = array<i64: 1, 4>}, {transform_indices = @transform_7, window_bounds = array<i64: 2, 4>}]} {
    %c0 = arith.constant 0 : index
    %c0_0 = arith.constant 0 : index
    %0 = vector.load %arg1[%c0, %c0_0] : memref<2x8xf32, #tpu.memory_space<vmem>>, vector<2x8xf32>
    %1 = arith.truncf %0 : vector<2x8xf32> to vector<2x8xbf16>
    %c0_1 = arith.constant 0 : index
    %c0_2 = arith.constant 0 : index
    %2 = vector.load %arg2[%c0_1, %c0_2] : memref<8x128xbf16, #tpu.memory_space<vmem>>, vector<8x128xbf16>
    %cst = arith.constant dense<0.000000e+00> : vector<2x128xf32>
    %3 = tpu.matmul %1, %2, %cst {dimension_numbers = #tpu.dot_dimension_numbers<[1], [0], [0], [1], [0, 0, 1, 1], [], []>} : vector<2x8xbf16>, vector<8x128xbf16>, vector<2x128xf32> -> vector<2x128xf32>
    %c0_3 = arith.constant 0 : index
    %c0_4 = arith.constant 0 : index
    %4 = vector.load %arg3[%c0_3, %c0_4] : memref<1x128xf32, #tpu.memory_space<vmem>>, vector<1x128xf32>
    %5 = vector.broadcast %4 : vector<1x128xf32> to vector<2x128xf32>
    %6 = arith.addf %3, %5 : vector<2x128xf32>
    %cst_5 = arith.constant 0.000000e+00 : f32
    %7 = vector.broadcast %cst_5 : f32 to vector<2x128xf32>
    %8 = arith.maximumf %6, %7 : vector<2x128xf32>
    %9 = arith.truncf %8 : vector<2x128xf32> to vector<2x128xbf16>
    %c0_6 = arith.constant 0 : index
    %c0_7 = arith.constant 0 : index
    %10 = vector.load %arg4[%c0_6, %c0_7] : memref<128x128xbf16, #tpu.memory_space<vmem>>, vector<128x128xbf16>
    %cst_8 = arith.constant dense<0.000000e+00> : vector<2x128xf32>
    %11 = tpu.matmul %9, %10, %cst_8 {dimension_numbers = #tpu.dot_dimension_numbers<[1], [0], [0], [1], [0, 0, 1, 1], [], []>} : vector<2x128xbf16>, vector<128x128xbf16>, vector<2x128xf32> -> vector<2x128xf32>
    %c0_9 = arith.constant 0 : index
    %c0_10 = arith.constant 0 : index
    %12 = vector.load %arg5[%c0_9, %c0_10] : memref<1x128xf32, #tpu.memory_space<vmem>>, vector<1x128xf32>
    %13 = vector.broadcast %12 : vector<1x128xf32> to vector<2x128xf32>
    %14 = arith.addf %11, %13 : vector<2x128xf32>
    %cst_11 = arith.constant 0.000000e+00 : f32
    %15 = vector.broadcast %cst_11 : f32 to vector<2x128xf32>
    %16 = arith.maximumf %14, %15 : vector<2x128xf32>
    %c0_12 = arith.constant 0 : index
    %c0_13 = arith.constant 0 : index
    %17 = vector.load %arg6[%c0_12, %c0_13] : memref<128x4xf32, #tpu.memory_space<vmem>>, vector<128x4xf32>
    %cst_14 = arith.constant dense<0.000000e+00> : vector<2x4xf32>
    %18 = tpu.matmul %16, %17, %cst_14 {dimension_numbers = #tpu.dot_dimension_numbers<[1], [0], [0], [1], [0, 0, 1, 1], [], []>} : vector<2x128xf32>, vector<128x4xf32>, vector<2x4xf32> -> vector<2x4xf32>
    %c0_15 = arith.constant 0 : index
    %c0_16 = arith.constant 0 : index
    %19 = vector.load %arg7[%c0_15, %c0_16] : memref<1x4xf32, #tpu.memory_space<vmem>>, vector<1x4xf32>
    %20 = vector.broadcast %19 : vector<1x4xf32> to vector<2x4xf32>
    %21 = arith.addf %18, %20 : vector<2x4xf32>
    %c0_17 = arith.constant 0 : index
    %c0_18 = arith.constant 0 : index
    %22 = vector.load %arg8[%c0_17, %c0_18] : memref<2x4xf32, #tpu.memory_space<vmem>>, vector<2x4xf32>
    tpu.vector_store %arg8[%c0_17, %c0_18], %21 {strides = array<i32>} : memref<2x4xf32, #tpu.memory_space<vmem>>, vector<2x4xf32>,
    return
  }
  func.func @transform_0(%arg0: i32) -> (i32, i32) {
    %c0_i32 = arith.constant 0 : i32
    %c0_i32_0 = arith.constant 0 : i32
    return %arg0, %c0_i32 : i32, i32
  }
  func.func @transform_1(%arg0: i32) -> (i32, i32) {
    %c0_i32 = arith.constant 0 : i32
    %c0_i32_0 = arith.constant 0 : i32
    %c0_i32_1 = arith.constant 0 : i32
    return %c0_i32, %c0_i32_0 : i32, i32
  }
  func.func @transform_2(%arg0: i32) -> (i32, i32) {
    %c0_i32 = arith.constant 0 : i32
    %c0_i32_0 = arith.constant 0 : i32
    %c0_i32_1 = arith.constant 0 : i32
    return %c0_i32, %c0_i32_0 : i32, i32
  }
  func.func @transform_3(%arg0: i32) -> (i32, i32) {
    %c0_i32 = arith.constant 0 : i32
    %c0_i32_0 = arith.constant 0 : i32
    %c0_i32_1 = arith.constant 0 : i32
    return %c0_i32, %c0_i32_0 : i32, i32
  }
  func.func @transform_4(%arg0: i32) -> (i32, i32) {
    %c0_i32 = arith.constant 0 : i32
    %c0_i32_0 = arith.constant 0 : i32
    %c0_i32_1 = arith.constant 0 : i32
    return %c0_i32, %c0_i32_0 : i32, i32
  }
  func.func @transform_5(%arg0: i32) -> (i32, i32) {
    %c0_i32 = arith.constant 0 : i32
    %c0_i32_0 = arith.constant 0 : i32
    %c0_i32_1 = arith.constant 0 : i32
    return %c0_i32, %c0_i32_0 : i32, i32
  }
  func.func @transform_6(%arg0: i32) -> (i32, i32) {
    %c0_i32 = arith.constant 0 : i32
    %c0_i32_0 = arith.constant 0 : i32
    %c0_i32_1 = arith.constant 0 : i32
    return %c0_i32, %c0_i32_0 : i32, i32
  }
  func.func @transform_7(%arg0: i32) -> (i32, i32) {
    %c0_i32 = arith.constant 0 : i32
    %c0_i32_0 = arith.constant 0 : i32
    return %arg0, %c0_i32 : i32, i32
  }
}

</mosaic_0001>

<bundles_post_ra>
// kernel: dqn_forward.1
= control target key start
LH: loop header
LB: loop body
LE: loop exit
PB: predicated region body
PF: predicated region fallthrough
CT: control target
= control target key end

     0   :  { %vm42_vm0 = vcmask 1043456   ;;  %vm38_vm1 = vcmask 64512   ;;  %v470_v1 = vmov 0.0   ;;  %vm471_vm2 = vmmov 0   ;;  %s613_s0 = inlined_call_operand.vmem [shape: f32[2,8], index: 0, kind: input, shape index: {}]   ;;  %s614_s1 = inlined_call_operand.vmem [shape: bf16[8,128], index: 1, kind: input, shape index: {}]   ;;  %s615_s2 = inlined_call_operand.vmem [shape: f32[1,128], index: 2, kind: input, shape index: {}]   ;;  %s616_s3 = inlined_call_operand.vmem [shape: bf16[128,128], index: 3, kind: input, shape index: {}]   ;;  %s617_s4 = inlined_call_operand.vmem [shape: f32[1,128], index: 4, kind: input, shape index: {}]   ;;  %s618_s5 = inlined_call_operand.vmem [shape: f32[128,4], index: 5, kind: input, shape index: {}]   ;;  %s619_s6 = inlined_call_operand.vmem [shape: f32[1,4], index: 6, kind: input, shape index: {}]   ;;  %s620_s7 = inlined_call_operand.hbm [shape: f32[2,4], index: 7, kind: output, shape index: {}]  }
   0x1   :  { %v30_v0 = vld [vmem:[%s614_s1] sm:$0xf]  ;;  %349 = vmatprep.subr.bf16.mxu0 %v470_v1  ;;  %351 = vmatprep.mubr.msk.bf16.mxu0 %vm471_vm2, %v470_v1  ;;  %v439_v6 = vld [vmem:[%s616_s3 + $0x8] sm:$0xff]   ;;  %v440_v7 = vld [vmem:[%s616_s3 + $0x10] sm:$0xff]  }
   0x2   :  { %v44_v2 = vsel %vm42_vm0, %v30_v0, 0  ;;  %v28_v3 = vld [vmem:[%s613_s0] sm:$0x3]  ;;  %355 = vmatprep.subr.bf16.mxu1 %v470_v1  ;;  %371 = vmatprep.mubr.msk.bf16.mxu1 %vm471_vm2, %v470_v1 }
   0x3   :  { %v438_v4 = vld [vmem:[%s616_s3] sm:$0xff]   ;;  %350 = vmatpush3.bf16.msra.mxu0 %v44_v2  ;;  %v29_v5 = vpack.c.bf16 %v28_v3, %v28_v3 }
   0x4   :  { %356 = vmatpush3.bf16.msra.mxu1 %v438_v4 }
   0x5   :  { %357 = vmatprep.subr.bf16.mxu1 %v470_v1 }
   0x6   :  { %352 = vmatmul.mubr.msk.bf16.vlgmr.msra.gmra.mrb[0].mxu0 %vm38_vm1, %v29_v5 }
   0x7   :  { %407 = vmatprep.mubr.msk.f32.mxu0 %vm471_vm2, %v470_v1 }
   0x8   :  { %358 = vmatpush3.bf16.msra.mxu1 %v439_v6 }
   0x9   :  { %359 = vmatprep.subr.bf16.mxu1 %v470_v1 }
   0xa   :  { %12 = vsyncpa [#allocation3], 0  ;;  %v441_v8 = vld [vmem:[%s616_s3 + $0x18] sm:$0xff]   ;;  %v442_v9 = vld [vmem:[%s616_s3 + $0x20] sm:$0xff]   ;;  %v472_v16 = vmov 0.0|0.0   ;;  %s473_s29 = smov [#allocation2]  }
   0xb   :  { %v443_v10 = vld [vmem:[%s616_s3 + $0x28] sm:$0xff]   ;;  %v444_v11 = vld [vmem:[%s616_s3 + $0x30] sm:$0xff]   ;;  %v445_v12 = vld [vmem:[%s616_s3 + $0x38] sm:$0xff]   ;;  %410 = vmatprep.subr.bf16.mxu0 %v472_v16  ;;  %s301_s1 = sshll.u32 %s473_s29, 4  ;;  %vm293_vm3 = vcmask 25600   ;;  %s302_s1 = int_to_ptr.vmem [resolvable:$true] %s301_s1 }
   0xc   :  { %360 = vmatpush3.bf16.msra.mxu1 %v440_v7  ;;  %v200_v13 = vld [vmem:[%s618_s5] sm:$0xff]  ;;  %v201_v14 = vld [vmem:[%s618_s5 + $0x8] sm:$0xff]  ;;  %v202_v15 = vld [vmem:[%s618_s5 + $0x10] sm:$0xff]  ;;  %p451_p1 = scmp.lt.s32.totalorder %s302_s1, %s302_s1 }
   0xd   :  { %361 = vmatprep.subr.bf16.mxu1 %v470_v1  ;;  %v411_v17 = vpack.c.bf16 %v201_v14, %v200_v13  ;;  %v203_v18 = vld [vmem:[%s618_s5 + $0x18] sm:$0xff]  ;;  %v204_v20 = vld [vmem:[%s618_s5 + $0x20] sm:$0xff]  ;;  %v205_v21 = vld [vmem:[%s618_s5 + $0x28] sm:$0xff] }
   0xe   :  { %v414_v19 = vpack.c.bf16 %v203_v18, %v202_v15  ;;  %v417_v22 = vpack.c.bf16 %v205_v21, %v204_v20  ;;  %v206_v23 = vld [vmem:[%s618_s5 + $0x30] sm:$0xff]  ;;  %v207_v24 = vld [vmem:[%s618_s5 + $0x38] sm:$0xff]  ;;  %v208_v26 = vld [vmem:[%s618_s5 + $0x40] sm:$0xff] }
   0xf   :  { %412 = vmatpush3.bf16.msra.mxu0 %v411_v17  ;;  %v420_v25 = vpack.c.bf16 %v207_v24, %v206_v23  ;;  %v209_v27 = vld [vmem:[%s618_s5 + $0x48] sm:$0xff]  ;;  %v210_v29 = vld [vmem:[%s618_s5 + $0x50] sm:$0xff]  ;;  %v211_v30 = vld [vmem:[%s618_s5 + $0x58] sm:$0xff] }
  0x10   :  { %362 = vmatpush3.bf16.msra.mxu1 %v441_v8  ;;  %413 = vmatprep.subr.bf16.mxu0 %v472_v16  ;;  %v423_v28 = vpack.c.bf16 %v209_v27, %v208_v26  ;;  %v426_v31 = vpack.c.bf16 %v211_v30, %v210_v29  ;;  %v212_v32 = vld [vmem:[%s618_s5 + $0x60] sm:$0xff]  ;;  %v213_v33 = vld [vmem:[%s618_s5 + $0x68] sm:$0xff]  ;;  %v214_v43 = vld [vmem:[%s618_s5 + $0x70] sm:$0xff] }
  0x11   :  { %363 = vmatprep.subr.bf16.mxu1 %v470_v1  ;;  %v429_v34 = vpack.c.bf16 %v213_v33, %v212_v32  ;;  %v309_v35 = vld [vmem:[%s615_s2] ss:$0 sm:$0xff]  ;;  %v215_v44 = vld [vmem:[%s618_s5 + $0x78] sm:$0xff] }
  0x12   :  { %v432_v45 = vpack.c.bf16 %v215_v44, %v214_v43  ;;  %v311_v46 = vld [vmem:[%s617_s4] ss:$0 sm:$0xff]  ;;  %s446_s4 = scalar_lea.vmem %s302_s1, 32 }
  0x13   :  { %415 = vmatpush3.bf16.msra.mxu0 %v414_v19  ;;  %v320_v53 = vld [vmem:[%s619_s6] ss:$0 sm:$0xff]  ;;  %p447_p0 = scmp.ne.s32.totalorder %s302_s1, %s446_s4  ;;  %p452_p2 = scmp.lt.s32.totalorder %s446_s4, %s446_s4 }
  0x14   :  { %364 = vmatpush3.bf16.msra.mxu1 %v442_v9  ;;  %416 = vmatprep.subr.bf16.mxu0 %v472_v16 }
  0x15   :  { %365 = vmatprep.subr.bf16.mxu1 %v470_v1  ;;  %p453_p3 = por %p452_p2, %p451_p1 }
  0x17   :  { %418 = vmatpush3.bf16.msra.mxu0 %v417_v22  ;;  %p454_p4 = pnand %p453_p3, %p447_p0 }
  0x18   :  { %366 = vmatpush3.bf16.msra.mxu1 %v443_v10  ;;  %419 = vmatprep.subr.bf16.mxu0 %v472_v16 }
  0x19   :  { %367 = vmatprep.subr.bf16.mxu1 %v470_v1 }
  0x1b   :  { %421 = vmatpush3.bf16.msra.mxu0 %v420_v25 }
  0x1c   :  { %368 = vmatpush3.bf16.msra.mxu1 %v444_v11  ;;  %422 = vmatprep.subr.bf16.mxu0 %v472_v16 }
  0x1d   :  { %369 = vmatprep.subr.bf16.mxu1 %v470_v1 }
  0x1f   :  { %424 = vmatpush3.bf16.msra.mxu0 %v423_v28 }
  0x20   :  { %370 = vmatpush3.bf16.msra.mxu1 %v445_v12  ;;  %425 = vmatprep.subr.bf16.mxu0 %v472_v16 }
  0x23   :  { %427 = vmatpush3.bf16.msra.mxu0 %v426_v31 }
  0x24   :  { %428 = vmatprep.subr.bf16.mxu0 %v472_v16 }
  0x27   :  { %430 = vmatpush3.bf16.msra.mxu0 %v429_v34 }
  0x28   :  { %431 = vmatprep.subr.bf16.mxu0 %v472_v16 }
  0x2b   :  { %433 = vmatpush3.bf16.msra.mxu0 %v432_v45 }
  0xd9   :  { %v80_v36 = vpop.f32.mrb[0].mxu0 }
  0xda   :  { %v81_v37 = vadd.f32 %v309_v35, %v80_v36  ;;  %v353_v38 = vpop.f32.mrb[1].mxu0 }
  0xdb   :  { %v83_v39 = vpop.f32.mrb[2].mxu0 }
  0xdc   :  { %v86_v40 = vmax.f32 %v81_v37, 0.0  ;;  %v354_v41 = vpop.f32.mrb[3].mxu0 }
  0xde   :  { %v87_v42 = vpack.c.bf16 %v86_v40, %v86_v40 }
  0xe0   :  { %372 = vmatmul.mubr.bf16.vlgmr.msra.gmra.mrb[0].mxu1 %v87_v42 }
 0x1b3   :  { %v193_v47 = vpop.f32.mrb[0].mxu1 }
 0x1b4   :  { %v194_v48 = vadd.f32 %v311_v46, %v193_v47  ;;  %v373_v49 = vpop.f32.mrb[1].mxu1 }
 0x1b5   :  { %v196_v50 = vpop.f32.mrb[2].mxu1 }
 0x1b6   :  { %v199_v51 = vmax.f32 %v194_v48, 0.0  ;;  %v374_v52 = vpop.f32.mrb[3].mxu1 }
 0x1b8   :  { %408 = vmatmul.mubr.f32.vlgmr.msra.gmra.mrb[4].mxu0 %v199_v51 }
 0x28b   :  { %v289_v54 = vpop.f32.mrb[4].mxu0 }
 0x28c   :  { %v290_v55 = vadd.f32 %v320_v53, %v289_v54  ;;  %v409_v56 = vpop.f32.mrb[5].mxu0 }
 0x28e   :  { %294 = vst.msk [vmem:[#allocation2] sm:$0x3] %vm293_vm3, %v290_v55 }
 0x28f   :  { %457 = shalt.err (!%p454_p4)
}
 0x290   :  { %s458_s8 = scalar_lea.hbm %s620_s7, 32 }
 0x291   :  { %p459_p5 = scmp.ne.s32.totalorder %s620_s7, %s458_s8  ;;  %p462_p6 = scmp.lt.u32.totalorder %s458_s8, %s620_s7 }
 0x293   :  { %p464_p7 = pnand %p462_p6, %p459_p5 }
 0x295   :  { %467 = shalt.err (!%p464_p7)
}
 0x296   :  { %304 = dma.vmem_to_hbm [thread:$0]  %s302_s1, 32, %s620_s7, [#allocation3]  }
 0x297   :  { %468 = dma.done.wait [#allocation3], 32  }
 0x298   :  { %469 = vsyncadd [#allocation3], 4294967264 }
 0x299   :  { %308 = vsyncpa [#allocation3], 1 }

</bundles_post_ra>
